<compile_context>
chip_gen: v6e
topology: v6e:2x2x1
jax: 0.10.0
libtpu: 0.0.40
codegen_flags: <defaults>
</compile_context>

<pallas_src>
import functools

import jax
import jax.numpy as jnp
from jax.experimental import pallas as pl
from jax.experimental.pallas import tpu as pltpu

DROP_P = 0.1
SCALE = 1.0 / (1.0 - DROP_P)


def _dropout_matmul_kernel(prob_ref, mask_ref, val_ref, out_ref):
    # prob_ref/mask_ref: (HB, S, S) bf16, val_ref: (HB, S, D) bf16,
    # out_ref: (HB, S, D) f32.
    masked = prob_ref[...] * mask_ref[...]                    # bf16 VPU multiply
    acc = jnp.einsum(
        "hqk,hkd->hqd", masked, val_ref[...],
        preferred_element_type=jnp.float32,                   # bf16 MXU, f32 acc
    )
    # Apply the inverted-dropout scale on the small (HB, S, D) output tile.
    out_ref[...] = (acc * SCALE).astype(out_ref.dtype)


@functools.partial(jax.jit, static_argnames=("hb",))
def dropout_matmul(probs, mask, values, *, hb):
    """probs/mask: [BH, S, S] bf16, values: [BH, S, D] bf16 -> [BH, S, D] f32."""
    BH, S, S2 = probs.shape
    assert S == S2
    D = values.shape[-1]
    assert values.shape == (BH, S, D)
    assert mask.shape == (BH, S, S)
    assert BH % hb == 0

    cost = pl.CostEstimate(
        flops=2 * BH * S * S * D,
        transcendentals=0,
        bytes_accessed=2 * BH * S * S * 2 + BH * S * D * 2 + BH * S * D * 4,
    )

    return pl.pallas_call(
        _dropout_matmul_kernel,
        out_shape=jax.ShapeDtypeStruct((BH, S, D), jnp.float32),
        grid=(BH // hb,),
        in_specs=[
            pl.BlockSpec((hb, S, S), lambda h: (h, 0, 0)),
            pl.BlockSpec((hb, S, S), lambda h: (h, 0, 0)),
            pl.BlockSpec((hb, S, D), lambda h: (h, 0, 0)),
        ],
        out_specs=pl.BlockSpec((hb, S, D), lambda h: (h, 0, 0)),
        compiler_params=pltpu.CompilerParams(
            dimension_semantics=("parallel",),
        ),
        cost_estimate=cost,
    )(probs, mask, values)


def run_module(x460, x454, key):
    """x460: [B, H, S, S] f32, x454: [B, H, S, D] f32 -> [B, H, S, D] f32."""
    B, H, S, _ = x460.shape
    D = x454.shape[-1]
    BH = B * H

    # bf16 feeds for the kernel: attention probs are in [0, 1] in the real
    # model, so bf16 is numerically safe and halves HBM traffic.
    probs = x460.reshape(BH, S, S).astype(jnp.bfloat16)
    values = x454.reshape(BH, S, D).astype(jnp.bfloat16)

    # Dropout keep-mask (1.0 = keep, 0.0 = drop), generated outside the kernel.
    # TODO(synk): switch to in-kernel pltpu.prng_seed/prng_random_bits once the
    # checker runs on a real TPU backend (no interpret-mode lowering exists).
    keep = jax.random.bernoulli(key, p=1.0 - DROP_P, shape=(BH, S, S))
    mask = keep.astype(jnp.bfloat16)

    # Block a couple of heads per grid step to amortize per-step overhead while
    # still leaving >= 2 parallel steps for megacore sharding.
    hb = 2 if BH % 2 == 0 else 1

    out = dropout_matmul(probs, mask, values, hb=hb)
    return out.reshape(B, H, S, D)


if __name__ == "__main__":
    # Small shapes consistent with the module's [1, 12, 384, {384, 64}] pattern.
    B, H, S, D = 1, 4, 256, 64
    key = jax.random.PRNGKey(0)
    k1, k2, k3 = jax.random.split(key, 3)
    x460 = jax.random.normal(k1, (B, H, S, S), dtype=jnp.float32)  # attn probs
    x454 = jax.random.normal(k2, (B, H, S, D), dtype=jnp.float32)  # values

    out = run_module(x460, x454, k3)
    out = jax.block_until_ready(out)

    assert out.shape == (B, H, S, D)
    assert out.dtype == jnp.float32
    assert bool(jnp.all(jnp.isfinite(out)))
    print("KERNEL_OK")
</pallas_src>

<mosaic_0001>
module attributes {stable_mosaic.version = 11 : i64} {
  func.func @_dropout_matmul_kernel(%arg0: i32, %arg1: memref<2x256x256xbf16, #tpu.memory_space<vmem>>, %arg2: memref<2x256x256xbf16, #tpu.memory_space<vmem>>, %arg3: memref<2x256x64xbf16, #tpu.memory_space<vmem>>, %arg4: memref<2x256x64xf32, #tpu.memory_space<vmem>>) attributes {dimension_semantics = [#tpu.dimension_semantics<parallel>], iteration_bounds = array<i64: 2>, scalar_prefetch = 0 : i64, scratch_operands = 0 : i64, tpu.core_type = #tpu.core_type<tc>, window_params = [{transform_indices = @transform_0, window_bounds = array<i64: 2, 256, 256>}, {transform_indices = @transform_1, window_bounds = array<i64: 2, 256, 256>}, {transform_indices = @transform_2, window_bounds = array<i64: 2, 256, 64>}, {transform_indices = @transform_3, window_bounds = array<i64: 2, 256, 64>}]} {
    %c0 = arith.constant 0 : index
    %c0_0 = arith.constant 0 : index
    %c0_1 = arith.constant 0 : index
    %0 = vector.load %arg1[%c0, %c0_0, %c0_1] : memref<2x256x256xbf16, #tpu.memory_space<vmem>>, vector<2x256x256xbf16>
    %c0_2 = arith.constant 0 : index
    %c0_3 = arith.constant 0 : index
    %c0_4 = arith.constant 0 : index
    %1 = vector.load %arg2[%c0_2, %c0_3, %c0_4] : memref<2x256x256xbf16, #tpu.memory_space<vmem>>, vector<2x256x256xbf16>
    %2 = arith.mulf %0, %1 : vector<2x256x256xbf16>
    %c0_5 = arith.constant 0 : index
    %c0_6 = arith.constant 0 : index
    %c0_7 = arith.constant 0 : index
    %3 = vector.load %arg3[%c0_5, %c0_6, %c0_7] : memref<2x256x64xbf16, #tpu.memory_space<vmem>>, vector<2x256x64xbf16>
    "tpu.trace_start"() <{level = 10 : i32, message = "hqk,hkd->hqd"}> : () -> ()
    %cst = arith.constant dense<0.000000e+00> : vector<2x256x64xf32>
    %4 = tpu.matmul %2, %3, %cst {dimension_numbers = #tpu.dot_dimension_numbers<[2], [1], [1], [2], [0, 0, 0, 1, 1, 2], [0], [0]>} : vector<2x256x256xbf16>, vector<2x256x64xbf16>, vector<2x256x64xf32> -> vector<2x256x64xf32>
    "tpu.trace_stop"() : () -> ()
    %cst_8 = arith.constant 1.11111116 : f32
    %5 = vector.broadcast %cst_8 : f32 to vector<2x256x64xf32>
    %6 = arith.mulf %4, %5 : vector<2x256x64xf32>
    %c0_9 = arith.constant 0 : index
    %c0_10 = arith.constant 0 : index
    %c0_11 = arith.constant 0 : index
    %7 = vector.load %arg4[%c0_9, %c0_10, %c0_11] : memref<2x256x64xf32, #tpu.memory_space<vmem>>, vector<2x256x64xf32>
    tpu.vector_store %arg4[%c0_9, %c0_10, %c0_11], %6 {strides = array<i32>} : memref<2x256x64xf32, #tpu.memory_space<vmem>>, vector<2x256x64xf32>,
    return
  }
  func.func @transform_0(%arg0: i32) -> (i32, i32, i32) {
    %c0_i32 = arith.constant 0 : i32
    %c0_i32_0 = arith.constant 0 : i32
    %c0_i32_1 = arith.constant 0 : i32
    return %arg0, %c0_i32, %c0_i32_0 : i32, i32, i32
  }
  func.func @transform_1(%arg0: i32) -> (i32, i32, i32) {
    %c0_i32 = arith.constant 0 : i32
    %c0_i32_0 = arith.constant 0 : i32
    %c0_i32_1 = arith.constant 0 : i32
    return %arg0, %c0_i32, %c0_i32_0 : i32, i32, i32
  }
  func.func @transform_2(%arg0: i32) -> (i32, i32, i32) {
    %c0_i32 = arith.constant 0 : i32
    %c0_i32_0 = arith.constant 0 : i32
    %c0_i32_1 = arith.constant 0 : i32
    return %arg0, %c0_i32, %c0_i32_0 : i32, i32, i32
  }
  func.func @transform_3(%arg0: i32) -> (i32, i32, i32) {
    %c0_i32 = arith.constant 0 : i32
    %c0_i32_0 = arith.constant 0 : i32
    %c0_i32_1 = arith.constant 0 : i32
    return %arg0, %c0_i32, %c0_i32_0 : i32, i32, i32
  }
}

</mosaic_0001>

<bundles_post_ra>
// kernel: dropout_matmul.1
= control target key start
LH: loop header
LB: loop body
LE: loop exit
PB: predicated region body
PF: predicated region fallthrough
CT: control target
= control target key end

     0   :  { %8 = vsyncpa [#allocation3], 0  ;;  %s2600_s0 = inlined_call_operand.hbm [shape: bf16[4,256,256], index: 0, kind: input, shape index: {}]   ;;  %s2601_s1 = inlined_call_operand.hbm [shape: bf16[4,256,256], index: 1, kind: input, shape index: {}]   ;;  %s2602_s2 = inlined_call_operand.vmem [shape: bf16[4,256,64], index: 2, kind: input, shape index: {}]   ;;  %s2603_s3 = inlined_call_operand.vmem [shape: f32[4,256,64], index: 3, kind: output, shape index: {}]  }
   0x1   :  { %10 = vsyncpa [#allocation3 + $0x1], 0 }
   0x2   :  { %11 = vsyncpa [#allocation5], 0 }
   0x3   :  { %13 = vsyncpa [#allocation5 + $0x1], 0  ;;  %s2134_s12 = smov 0   ;;  %s2136_s13 = smov 0  }
   0x4   :  { %s2138_s14 = smov 0   ;;  %s2140_s15 = smov 0  }
   0x5 LB: > { %s1587_s16 = sadd.s32 4294967295, %s2108_s15   ;;  %s2154_s17 = sadd.s32 1, %s2108_s15   ;;  %s2108_s15 = sphi %s2140_s15, %s2613_s15   ;;  %s2104_s14 = sphi %s2138_s14, %s2612_s14   ;;  %s2100_s13 = sphi %s2136_s13, %s2611_s13   ;;  %s2096_s12 = sphi %s2134_s12, %s2610_s12  }
   0x6   : > { %s23_s18 = ssub.s32 %s2108_s15, %s2154_s17  ;;  %s26_s19 = sadd.s32 1, %s2104_s14 }
   0x7   : > { %p24_p0 = scmp.eq.s32.totalorder %s23_s18, 0  ;;  %p33_p1 = scmp.ne.s32.totalorder %s2104_s14, %s2100_s13 }
   0x8   : > { %p34_p2 = scmp.eq.s32.totalorder %s2108_s15, 0  ;;  %p39_p3 = scmp.ne.s32.totalorder %s2100_s13, %s2096_s12 }
   0x9   : > { %s2164_s20 = scalar_select %p24_p0, %s2104_s14, %s26_s19  }
   0xa   : > { %p35_p4 = por %p34_p2, %p33_p1  ;;  %p40_p5 = scmp.eq.s32.totalorder %s1587_s16, 0 }
   0xb   : > { %p1947_p6 = scmp.lt.s32.totalorder %s2108_s15, 2  ;;  %s2174_s22 = sand.u32 1, %s2104_s14  }
   0xc   : > { %p2169_p7 = por %p40_p5, %p39_p3  ;;  %s1591_s23 = sshll.u32 %s2174_s22, 9 }
   0xd   : > { %s1707_s24 = sshll.u32 %s2108_s15, 13  ;;  %s145_s28 = scalar_lea.vmem [#allocation2], %s1591_s23 }
   0xe   : > { %s2605_s21 = scalar_select %p2169_p7, 1, 0 }
   0xf   : > { %s2183_s27 = scalar_lea.hbm %s2600_s0, %s1707_s24  ;;  %s153_s29 = sshll.u32 %s145_s28, 4  ;;  %s2187_s29 = int_to_ptr.vmem [resolvable:$true] %s153_s29 }
  0x10   : > { %p2189_p8 = pnand %p1947_p6, %p35_p4  ;;  %s142_s4 = scalar_lea.sflag [#allocation3], %s2174_s22 }
  0x11   : > { %s2014_s5 = scalar_lea.hbm %s2183_s27, 8192  ;;  %s2019_s8 = scalar_lea.hbm %s2600_s0, 16384 }
  0x12   : > { %p2015_p10 = scmp.ne.s32.totalorder %s2183_s27, %s2014_s5  ;;  %p2016_p11 = pneg %p2189_p8 }
  0x13   : > { %p2020_p0 = scmp.lt.s32.totalorder %s2183_s27, %s2600_s0  ;;  %p2021_p1 = scmp.lt.s32.totalorder %s2019_s8, %s2014_s5 }
  0x14   : > { %p2017_p12 = pnand %p2016_p11, %p2015_p10 }
  0x15   : > { %p2022_p2 = por %p2021_p1, %p2020_p0 }
  0x16   : > { %p2018_p13 = pneg %p2017_p12 }
  0x18   : > { %p2023_p3 = pnand %p2022_p2, %p2018_p13 }
  0x1a   : > { %2026 = shalt.err (!%p2023_p3)
}
  0x1b   : > { %s2027_s11 = scalar_lea.vmem %s2187_s29, 8192  ;;  %s2110_s12 = smov [#allocation2]  }
  0x1c   : > { %p2028_p4 = scmp.ne.s32.totalorder %s2187_s29, %s2027_s11  ;;  %s2032_s18 = sshll.u32 %s2110_s12, 4  ;;  %s2033_s18 = int_to_ptr.vmem [resolvable:$false] %s2032_s18 }
  0x1d   : > { %s2034_s19 = scalar_lea.vmem %s2033_s18, 16384  ;;  %p2035_p10 = scmp.lt.s32.totalorder %s2187_s29, %s2033_s18 }
  0x1e   : > { %p2030_p5 = pnand %p2028_p4, %p2016_p11  ;;  %p2036_p12 = scmp.lt.s32.totalorder %s2034_s19, %s2027_s11 }
  0x20   : > { %p2031_p6 = pneg %p2030_p5  ;;  %p2037_p9 = por %p2036_p12, %p2035_p10 }
  0x22   : > { %p2038_p0 = pnand %p2037_p9, %p2031_p6 }
  0x24   : > { %2041 = shalt.err (!%p2038_p0)
}
  0x25   : > { %s2111_s25 = smov 128   ;;  %s2112_s26 = smov 8  }
  0x26   : > { %1943 = dma.hbm_to_vmem [thread:$0]  (!%p2189_p8), %s2183_s27, 8192, %s2187_s29, %s142_s4, %s2111_s25, %s2111_s25, %s2112_s26  }
  0x27   : > { %p193_p9 = scmp.lt.s32.totalorder %s2108_s15, 3  ;;  %s2230_s6 = scalar_lea.hbm %s2601_s1, %s1707_s24 }
  0x28   : > { %p2607_p13 = scmp.ge.s32.totalorder %s2108_s15, 1  ;;  %s167_s8 = scalar_lea.vmem [#allocation4], %s1591_s23 }
  0x29   : > { %s175_s9 = sshll.u32 %s167_s8, 4  ;;  %s164_s27 = scalar_lea.sflag [#allocation5], %s2174_s22  ;;  %s2240_s9 = int_to_ptr.vmem [resolvable:$true] %s175_s9 }
  0x2a   : > { %p2234_p1 = pnand %p2607_p13, %p193_p9  ;;  %s2042_s29 = scalar_lea.hbm %s2230_s6, 8192 }
  0x2b   : > { %p2043_p2 = scmp.ne.s32.totalorder %s2230_s6, %s2042_s29  ;;  %s2047_s10 = scalar_lea.hbm %s2601_s1, 16384 }
  0x2c   : > { %p2048_p5 = scmp.lt.s32.totalorder %s2230_s6, %s2601_s1  ;;  %p2049_p6 = scmp.lt.s32.totalorder %s2047_s10, %s2042_s29 }
  0x2d   : > { %p2045_p3 = pnand %p2043_p2, %p2016_p11 }
  0x2e   : > { %p2050_p10 = por %p2049_p6, %p2048_p5 }
  0x2f   : > { %p2046_p4 = pneg %p2045_p3 }
  0x31   : > { %p2051_p12 = pnand %p2050_p10, %p2046_p4 }
  0x33   : > { %2054 = shalt.err (!%p2051_p12)
}
  0x34   : > { %s2055_s22 = scalar_lea.vmem %s2240_s9, 8192  ;;  %s2113_s23 = smov [#allocation4]  }
  0x35   : > { %p2056_p0 = scmp.ne.s32.totalorder %s2240_s9, %s2055_s22  ;;  %s2060_s18 = sshll.u32 %s2113_s23, 4  ;;  %s2061_s18 = int_to_ptr.vmem [resolvable:$false] %s2060_s18 }
  0x36   : > { %s2062_s19 = scalar_lea.vmem %s2061_s18, 16384  ;;  %p2063_p2 = scmp.lt.s32.totalorder %s2240_s9, %s2061_s18 }
  0x37   : > { %p2058_p9 = pnand %p2056_p0, %p2016_p11  ;;  %p2064_p3 = scmp.lt.s32.totalorder %s2062_s19, %s2055_s22 }
  0x39   : > { %p2059_p13 = pneg %p2058_p9  ;;  %p2065_p7 = por %p2064_p3, %p2063_p2 }
  0x3b   : > { %p2066_p5 = pnand %p2065_p7, %p2059_p13 }
  0x3d   : > { %2069 = shalt.err (!%p2066_p5)
}
  0x3e   : > { %1946 = dma.hbm_to_vmem [thread:$0]  (!%p2189_p8), %s2230_s6, 8192, %s2240_s9, %s164_s27, %s2111_s25, %s2111_s25, %s2112_s26  }
  0x3f   : > { %197 = sbr.rel (%p2234_p1) target bundleno = 436 (0x1b4), region = 32  ;;  %s199_s28 = sand.u32 (!%p2234_p1), 1, %s2100_s13  }
  0x40   : > { %s1600_s5 = sshll.u32 (!%p2234_p1), %s199_s28, 9  ;;  %s200_s8 = scalar_lea.sflag (!%p2234_p1), [#allocation3], %s199_s28 }
  0x41   : > { %s2271_s29 = scalar_lea.vmem (!%p2234_p1), [#allocation2], %s1600_s5  ;;  %p2609_p7 = scmp.ne.s32.totalorder (!%p2234_p1), %s2605_s21, 0 }
  0x44   : > { %2087 = dma.done.wait (%p2609_p7), %s200_s8, 8192  }
  0x45   : > { %2089 = vsyncadd (%p2609_p7), %s200_s8, 4294959104  ;;  %s209_s30 = scalar_lea.sflag [#allocation5], %s199_s28  ;;  %s2277_s24 = scalar_lea.vmem [#allocation4], %s1600_s5 }
  0x46   : > { %2091 = dma.done.wait (%p2609_p7), %s209_s30, 8192  }
  0x47   : > { %2093 = vsyncadd (%p2609_p7), %s209_s30, 4294959104  ;;  %s1602_s25 = sshll.u32 %s1587_s16, 1  ;;  %v264_v32 = vld [vmem:[%s2271_s29] sm:$0xff]  ;;  %v265_v33 = vld [vmem:[%s2271_s29 + $0x8] sm:$0xff]  ;;  %vm1418_vm0 = vcmask 523264  }
  0x48   : > { %p250_p8 = scmp.lt.s32.totalorder %s1602_s25, 3  ;;  %v328_v34 = vld [vmem:[%s2277_s24] sm:$0xff]  ;;  %v329_v35 = vld [vmem:[%s2277_s24 + $0x8] sm:$0xff]  ;;  %v266_v42 = vld [vmem:[%s2271_s29 + $0x10] sm:$0xff] }
  0x49   : > { %v392_v36 = vmul.bf16 %v328_v34, %v264_v32  ;;  %v296_v37 = vld [vmem:[%s2271_s29 + $0x100] sm:$0xff]  ;;  %v297_v38 = vld [vmem:[%s2271_s29 + $0x108] sm:$0xff]  ;;  %v393_v39 = vmul.bf16 %v329_v35, %v265_v33  ;;  %v267_v45 = vld [vmem:[%s2271_s29 + $0x18] sm:$0xff] }
  0x4a   : > { %s2615_s25 = smov (!%p250_p8, %s1602_s25), 3  ;;  %v360_v40 = vld [vmem:[%s2277_s24 + $0x100] sm:$0xff]  ;;  %v361_v41 = vld [vmem:[%s2277_s24 + $0x108] sm:$0xff]  ;;  %v330_v46 = vld [vmem:[%s2277_s24 + $0x10] sm:$0xff] }
  0x4b   : > { %s1710_s26 = sshll.u32 %s2615_s25, 7  ;;  %v424_v43 = vmul.bf16 %v360_v40, %v296_v37  ;;  %v425_v44 = vmul.bf16 %v361_v41, %v297_v38  ;;  %v331_v47 = vld [vmem:[%s2277_s24 + $0x18] sm:$0xff]  ;;  %v1609_v48 = vcombine.high %v392_v36, %v393_v39  ;;  %v1608_v49 = vcombine.low %v392_v36, %v393_v39  ;;  %v298_v52 = vld [vmem:[%s2271_s29 + $0x110] sm:$0xff]  ;;  %v268_v59 = vld [vmem:[%s2271_s29 + $0x20] sm:$0xff]  ;;  %s1711_s15 = sshll.u32 %s2615_s25, 8 }
  0x4c   : > { %s2291_s9 = scalar_lea.vmem %s2602_s2, %s1710_s26  ;;  %v394_v50 = vmul.bf16 %v330_v46, %v266_v42  ;;  %v395_v51 = vmul.bf16 %v331_v47, %v267_v45  ;;  %v299_v53 = vld [vmem:[%s2271_s29 + $0x118] sm:$0xff]  ;;  %v362_v54 = vld [vmem:[%s2277_s24 + $0x110] sm:$0xff]  ;;  %v269_v60 = vld [vmem:[%s2271_s29 + $0x28] sm:$0xff]  ;;  %s2457_s27 = scalar_lea.vmem %s2603_s3, %s1711_s15 }
  0x4d   : > { %v1982_v0 = vld [vmem:[%s2291_s9 + $0x78] sm:$0xff]   ;;  %v1986_v4 = vld [vmem:[%s2291_s9 + $0x70] sm:$0xff]   ;;  %v1990_v8 = vld [vmem:[%s2291_s9 + $0x68] sm:$0xff]   ;;  %v1657_v55 = vcombine.high %v424_v43, %v425_v44  ;;  %v1656_v56 = vcombine.low %v424_v43, %v425_v44  ;;  %v426_v58 = vmul.bf16 %v362_v54, %v298_v52  ;;  %808 = vmatprep.mubr.bf16.mxu0 %v1609_v48 }
  0x4e   : > { %v1983_v1 = vld [vmem:[%s2291_s9 + $0xf8] sm:$0xff]   ;;  %1712 = vmatprep.subr.bf16.mxu0 %v1982_v0  ;;  %v1987_v5 = vld [vmem:[%s2291_s9 + $0xf0] sm:$0xff]   ;;  %v1991_v9 = vld [vmem:[%s2291_s9 + $0xe8] sm:$0xff]   ;;  %v1611_v61 = vcombine.high %v394_v50, %v395_v51 }
  0x4f   : > { %v1984_v2 = vld [vmem:[%s2291_s9 + $0x38] sm:$0xff]   ;;  %1824 = vmatprep.subr.bf16.mxu1 %v1983_v1  ;;  %v1988_v6 = vld [vmem:[%s2291_s9 + $0x30] sm:$0xff]   ;;  %v1992_v10 = vld [vmem:[%s2291_s9 + $0x28] sm:$0xff]   ;;  %1225 = vmatprep.mubr.bf16.mxu1 %v1657_v55 }
  0x50   : > { %v1985_v3 = vld [vmem:[%s2291_s9 + $0xb8] sm:$0xff]   ;;  %1713 = vmatpush3.bf16.msra.mxu0 %v1984_v2  ;;  %v1989_v7 = vld [vmem:[%s2291_s9 + $0xb0] sm:$0xff]   ;;  %v1993_v11 = vld [vmem:[%s2291_s9 + $0xa8] sm:$0xff]  }
  0x51   : > { %1825 = vmatpush3.bf16.msra.mxu1 %v1985_v3  ;;  %1714 = vmatprep.subr.bf16.mxu0 %v1986_v4  ;;  %v1994_v12 = vld [vmem:[%s2291_s9 + $0x60] sm:$0xff]   ;;  %v1998_v16 = vld [vmem:[%s2291_s9 + $0x58] sm:$0xff]   ;;  %v2002_v20 = vld [vmem:[%s2291_s9 + $0x50] sm:$0xff]  }
  0x52   : > { %1826 = vmatprep.subr.bf16.mxu1 %v1987_v5  ;;  %v1995_v13 = vld [vmem:[%s2291_s9 + $0xe0] sm:$0xff]   ;;  %v1999_v17 = vld [vmem:[%s2291_s9 + $0xd8] sm:$0xff]   ;;  %v2003_v21 = vld [vmem:[%s2291_s9 + $0xd0] sm:$0xff]  }
  0x53   : > { %v1996_v14 = vld [vmem:[%s2291_s9 + $0x20] sm:$0xff]   ;;  %v2000_v18 = vld [vmem:[%s2291_s9 + $0x18] sm:$0xff]   ;;  %v2004_v22 = vld [vmem:[%s2291_s9 + $0x10] sm:$0xff]  }
  0x54   : > { %1715 = vmatpush3.bf16.msra.mxu0 %v1988_v6  ;;  %v1997_v15 = vld [vmem:[%s2291_s9 + $0xa0] sm:$0xff]   ;;  %v2001_v19 = vld [vmem:[%s2291_s9 + $0x98] sm:$0xff]   ;;  %v2005_v23 = vld [vmem:[%s2291_s9 + $0x90] sm:$0xff]  }
  0x55   : > { %1827 = vmatpush3.bf16.msra.mxu1 %v1989_v7  ;;  %1716 = vmatprep.subr.bf16.mxu0 %v1990_v8  ;;  %v2006_v24 = vld [vmem:[%s2291_s9 + $0x48] sm:$0xff]   ;;  %v2010_v28 = vld [vmem:[%s2291_s9 + $0x40] sm:$0xff]   ;;  %v363_v57 = vld [vmem:[%s2277_s24 + $0x118] sm:$0xff] }
  0x56   : > { %1828 = vmatprep.subr.bf16.mxu1 %v1991_v9  ;;  %v2007_v25 = vld [vmem:[%s2291_s9 + $0xc8] sm:$0xff]   ;;  %v2011_v29 = vld [vmem:[%s2291_s9 + $0xc0] sm:$0xff]   ;;  %v427_v62 = vmul.bf16 %v363_v57, %v299_v53  ;;  %v274_v45 = vld [vmem:[%s2271_s29 + $0x50] sm:$0xff] }
  0x57   : > { %v2008_v26 = vld [vmem:[%s2291_s9 + $0x8] sm:$0xff]   ;;  %v2012_v30 = vld [vmem:[%s2291_s9] sm:$0xff]   ;;  %v275_v46 = vld [vmem:[%s2271_s29 + $0x58] sm:$0xff] }
  0x58   : > { %1717 = vmatpush3.bf16.msra.mxu0 %v1992_v10  ;;  %v2009_v27 = vld [vmem:[%s2291_s9 + $0x88] sm:$0xff]   ;;  %v2013_v31 = vld [vmem:[%s2291_s9 + $0x80] sm:$0xff]   ;;  %v1659_v5 = vcombine.high %v426_v58, %v427_v62  ;;  %v1610_v10 = vcombine.low %v394_v50, %v395_v51  ;;  %v338_v48 = vld [vmem:[%s2277_s24 + $0x50] sm:$0xff] }
  0x59   : > { %1829 = vmatpush3.bf16.msra.mxu1 %v1993_v11  ;;  %1718 = vmatprep.subr.bf16.mxu0 %v1994_v12  ;;  %v332_v63 = vld [vmem:[%s2277_s24 + $0x20] sm:$0xff]  ;;  %v333_v0 = vld [vmem:[%s2277_s24 + $0x28] sm:$0xff]  ;;  %v1658_v11 = vcombine.low %v426_v58, %v427_v62  ;;  %v306_v50 = vld [vmem:[%s2271_s29 + $0x150] sm:$0xff]  ;;  %v402_v54 = vmul.bf16 %v338_v48, %v274_v45 }
  0x5a   : > { %1830 = vmatprep.subr.bf16.mxu1 %v1995_v13  ;;  %v300_v1 = vld [vmem:[%s2271_s29 + $0x120] sm:$0xff]  ;;  %v301_v2 = vld [vmem:[%s2271_s29 + $0x128] sm:$0xff]  ;;  %v396_v6 = vmul.bf16 %v332_v63, %v268_v59  ;;  %v397_v7 = vmul.bf16 %v333_v0, %v269_v60  ;;  %v270_v13 = vld [vmem:[%s2271_s29 + $0x30] sm:$0xff] }
  0x5b   : > { %v364_v3 = vld [vmem:[%s2277_s24 + $0x120] sm:$0xff]  ;;  %v365_v4 = vld [vmem:[%s2277_s24 + $0x128] sm:$0xff]  ;;  %v307_v51 = vld [vmem:[%s2271_s29 + $0x158] sm:$0xff] }
  0x5c   : > { %1719 = vmatpush3.bf16.msra.mxu0 %v1996_v14  ;;  %v428_v8 = vmul.bf16 %v364_v3, %v300_v1  ;;  %v429_v9 = vmul.bf16 %v365_v4, %v301_v2  ;;  %v1613_v12 = vcombine.high %v396_v6, %v397_v7  ;;  %v271_v14 = vld [vmem:[%s2271_s29 + $0x38] sm:$0xff]  ;;  %v336_v32 = vld [vmem:[%s2277_s24 + $0x40] sm:$0xff]  ;;  %v337_v33 = vld [vmem:[%s2277_s24 + $0x48] sm:$0xff] }
  0x5d   : > { %1831 = vmatpush3.bf16.msra.mxu1 %v1997_v15  ;;  %1720 = vmatprep.subr.bf16.mxu0 %v1998_v16  ;;  %v334_v16 = vld [vmem:[%s2277_s24 + $0x30] sm:$0xff]  ;;  %v304_v34 = vld [vmem:[%s2271_s29 + $0x140] sm:$0xff]  ;;  %v305_v35 = vld [vmem:[%s2271_s29 + $0x148] sm:$0xff] }
  0x5e   : > { %1832 = vmatprep.subr.bf16.mxu1 %v1999_v17  ;;  %v1661_v15 = vcombine.high %v428_v8, %v429_v9  ;;  %v335_v17 = vld [vmem:[%s2277_s24 + $0x38] sm:$0xff]  ;;  %v368_v36 = vld [vmem:[%s2277_s24 + $0x140] sm:$0xff]  ;;  %v369_v37 = vld [vmem:[%s2277_s24 + $0x148] sm:$0xff] }
  0x5f   : > { %v432_v40 = vmul.bf16 %v368_v36, %v304_v34  ;;  %v433_v41 = vmul.bf16 %v369_v37, %v305_v35  ;;  %v370_v52 = vld [vmem:[%s2277_s24 + $0x150] sm:$0xff]  ;;  %v371_v53 = vld [vmem:[%s2277_s24 + $0x158] sm:$0xff]  ;;  %v277_v62 = vld [vmem:[%s2271_s29 + $0x68] sm:$0xff] }
  0x60   : > { %1721 = vmatpush3.bf16.msra.mxu0 %v2000_v18  ;;  %v302_v18 = vld [vmem:[%s2271_s29 + $0x130] sm:$0xff]  ;;  %v435_v57 = vmul.bf16 %v371_v53, %v307_v51  ;;  %v340_v0 = vld [vmem:[%s2277_s24 + $0x60] sm:$0xff]  ;;  %v341_v1 = vld [vmem:[%s2277_s24 + $0x68] sm:$0xff] }
  0x61   : > { %1833 = vmatpush3.bf16.msra.mxu1 %v2001_v19  ;;  %1722 = vmatprep.subr.bf16.mxu0 %v2002_v20  ;;  %v303_v19 = vld [vmem:[%s2271_s29 + $0x138] sm:$0xff]  ;;  %v366_v20 = vld [vmem:[%s2277_s24 + $0x130] sm:$0xff]  ;;  %v1665_v47 = vcombine.high %v432_v40, %v433_v41  ;;  %v1664_v59 = vcombine.low %v432_v40, %v433_v41  ;;  %v308_v2 = vld [vmem:[%s2271_s29 + $0x160] sm:$0xff] }
  0x62   : > { %1834 = vmatprep.subr.bf16.mxu1 %v2003_v21  ;;  %v367_v21 = vld [vmem:[%s2277_s24 + $0x138] sm:$0xff]  ;;  %v309_v3 = vld [vmem:[%s2271_s29 + $0x168] sm:$0xff]  ;;  %v372_v4 = vld [vmem:[%s2277_s24 + $0x160] sm:$0xff] }
  0x63   : > { %v312_v34 = vld [vmem:[%s2271_s29 + $0x180] sm:$0xff]  ;;  %v313_v35 = vld [vmem:[%s2271_s29 + $0x188] sm:$0xff]  ;;  %v282_v45 = vld [vmem:[%s2271_s29 + $0x90] sm:$0xff] }
  0x64   : > { %1723 = vmatpush3.bf16.msra.mxu0 %v2004_v22  ;;  %v398_v22 = vmul.bf16 %v334_v16, %v270_v13  ;;  %v278_v13 = vld [vmem:[%s2271_s29 + $0x70] sm:$0xff]  ;;  %v376_v36 = vld [vmem:[%s2277_s24 + $0x180] sm:$0xff]  ;;  %v377_v37 = vld [vmem:[%s2277_s24 + $0x188] sm:$0xff] }
  0x65   : > { %1835 = vmatpush3.bf16.msra.mxu1 %v2005_v23  ;;  %1724 = vmatprep.subr.bf16.mxu0 %v2006_v24  ;;  %v399_v23 = vmul.bf16 %v335_v17, %v271_v14  ;;  %v430_v24 = vmul.bf16 %v366_v20, %v302_v18  ;;  %v279_v14 = vld [vmem:[%s2271_s29 + $0x78] sm:$0xff]  ;;  %v342_v16 = vld [vmem:[%s2277_s24 + $0x70] sm:$0xff]  ;;  %v440_v40 = vmul.bf16 %v376_v36, %v312_v34  ;;  %v320_v34 = vld [vmem:[%s2271_s29 + $0x1c0] sm:$0xff] }
  0x66   : > { %1836 = vmatprep.subr.bf16.mxu1 %v2007_v25  ;;  %v431_v25 = vmul.bf16 %v367_v21, %v303_v19  ;;  %v343_v17 = vld [vmem:[%s2277_s24 + $0x78] sm:$0xff]  ;;  %v310_v18 = vld [vmem:[%s2271_s29 + $0x170] sm:$0xff]  ;;  %v441_v41 = vmul.bf16 %v377_v37, %v313_v35  ;;  %v321_v35 = vld [vmem:[%s2271_s29 + $0x1c8] sm:$0xff] }
  0x67   : > { %v1614_v42 = vcombine.low %v398_v22, %v399_v23  ;;  %v311_v19 = vld [vmem:[%s2271_s29 + $0x178] sm:$0xff]  ;;  %v374_v20 = vld [vmem:[%s2277_s24 + $0x170] sm:$0xff]  ;;  %v384_v36 = vld [vmem:[%s2277_s24 + $0x1c0] sm:$0xff] }
  0x68   : > { %1725 = vmatpush3.bf16.msra.mxu0 %v2008_v26  ;;  %v1612_v26 = vcombine.low %v396_v6, %v397_v7  ;;  %v1662_v43 = vcombine.low %v430_v24, %v431_v25  ;;  %v405_v7 = vmul.bf16 %v341_v1, %v277_v62  ;;  %v375_v21 = vld [vmem:[%s2277_s24 + $0x178] sm:$0xff]  ;;  %v346_v48 = vld [vmem:[%s2277_s24 + $0x90] sm:$0xff]  ;;  %v285_v62 = vld [vmem:[%s2271_s29 + $0xa8] sm:$0xff] }
  0x69   : > { %1837 = vmatpush3.bf16.msra.mxu1 %v2009_v27  ;;  %1726 = vmatprep.subr.bf16.mxu0 %v2010_v28  ;;  %v1660_v27 = vcombine.low %v428_v8, %v429_v9  ;;  %v1615_v28 = vcombine.high %v398_v22, %v399_v23  ;;  %v436_v8 = vmul.bf16 %v372_v4, %v308_v2  ;;  %v315_v51 = vld [vmem:[%s2271_s29 + $0x198] sm:$0xff]  ;;  %v349_v1 = vld [vmem:[%s2277_s24 + $0xa8] sm:$0xff]  ;;  %v316_v2 = vld [vmem:[%s2271_s29 + $0x1a0] sm:$0xff] }
  0x6a   : > { %1838 = vmatprep.subr.bf16.mxu1 %v2011_v29  ;;  %v272_v29 = vld [vmem:[%s2271_s29 + $0x40] sm:$0xff]  ;;  %v406_v22 = vmul.bf16 %v342_v16, %v278_v13  ;;  %v407_v23 = vmul.bf16 %v343_v17, %v279_v14  ;;  %v379_v53 = vld [vmem:[%s2277_s24 + $0x198] sm:$0xff]  ;;  %v286_v13 = vld [vmem:[%s2271_s29 + $0xb0] sm:$0xff] }
  0x6b   : > { %v400_v38 = vmul.bf16 %v336_v32, %v272_v29  ;;  %v280_v29 = vld [vmem:[%s2271_s29 + $0x80] sm:$0xff]  ;;  %v287_v14 = vld [vmem:[%s2271_s29 + $0xb8] sm:$0xff]  ;;  %v350_v16 = vld [vmem:[%s2277_s24 + $0xb0] sm:$0xff] }
  0x6c   : > { %1727 = vmatpush3.bf16.msra.mxu0 %v2012_v30  ;;  %v273_v30 = vld [vmem:[%s2271_s29 + $0x48] sm:$0xff]  ;;  %v344_v32 = vld [vmem:[%s2277_s24 + $0x80] sm:$0xff]  ;;  %v351_v17 = vld [vmem:[%s2277_s24 + $0xb8] sm:$0xff] }
  0x6d   : > { %1839 = vmatpush3.bf16.msra.mxu1 %v2013_v31  ;;  %v1663_v31 = vcombine.high %v430_v24, %v431_v25  ;;  %v401_v39 = vmul.bf16 %v337_v33, %v273_v30  ;;  %v438_v24 = vmul.bf16 %v374_v20, %v310_v18  ;;  %v439_v25 = vmul.bf16 %v375_v21, %v311_v19  ;;  %v281_v30 = vld [vmem:[%s2271_s29 + $0x88] sm:$0xff]  ;;  %v380_v4 = vld [vmem:[%s2277_s24 + $0x1a0] sm:$0xff]  ;;  %v318_v18 = vld [vmem:[%s2271_s29 + $0x1b0] sm:$0xff] }
  0x6e   : > { %v345_v33 = vld [vmem:[%s2277_s24 + $0x88] sm:$0xff]  ;;  %v319_v19 = vld [vmem:[%s2271_s29 + $0x1b8] sm:$0xff]  ;;  %v382_v20 = vld [vmem:[%s2277_s24 + $0x1b0] sm:$0xff] }
  0x6f   : > { %809 = vmatmul.mubr.bf16.vlgmr.msra.gmra.mxu0 %v1608_v49  ;;  %v1617_v44 = vcombine.high %v400_v38, %v401_v39  ;;  %v339_v49 = vld [vmem:[%s2277_s24 + $0x58] sm:$0xff]  ;;  %v1616_v58 = vcombine.low %v400_v38, %v401_v39  ;;  %v408_v38 = vmul.bf16 %v344_v32, %v280_v29  ;;  %v409_v39 = vmul.bf16 %v345_v33, %v281_v30  ;;  %v288_v29 = vld [vmem:[%s2271_s29 + $0xc0] sm:$0xff]  ;;  %v289_v30 = vld [vmem:[%s2271_s29 + $0xc8] sm:$0xff] }
  0x70   : > { %1226 = vmatmul.mubr.bf16.vlgmr.msra.gmra.mxu1 %v1656_v56  ;;  %816 = vmatprep.mubr.bf16.mxu0 %v1611_v61  ;;  %v403_v55 = vmul.bf16 %v339_v49, %v275_v46  ;;  %v434_v56 = vmul.bf16 %v370_v52, %v306_v50  ;;  %v276_v61 = vld [vmem:[%s2271_s29 + $0x60] sm:$0xff]  ;;  %v283_v46 = vld [vmem:[%s2271_s29 + $0x98] sm:$0xff]  ;;  %v314_v50 = vld [vmem:[%s2271_s29 + $0x190] sm:$0xff] }
  0x71   : > { %1233 = vmatprep.mubr.bf16.mxu1 %v1659_v5  ;;  %v373_v5 = vld [vmem:[%s2277_s24 + $0x168] sm:$0xff]  ;;  %v404_v6 = vmul.bf16 %v340_v0, %v276_v61  ;;  %v347_v49 = vld [vmem:[%s2277_s24 + $0x98] sm:$0xff]  ;;  %v378_v52 = vld [vmem:[%s2277_s24 + $0x190] sm:$0xff] }
  0x72   : > { %v1619_v60 = vcombine.high %v402_v54, %v403_v55  ;;  %v1667_v63 = vcombine.high %v434_v56, %v435_v57  ;;  %v437_v9 = vmul.bf16 %v373_v5, %v309_v3  ;;  %v284_v61 = vld [vmem:[%s2271_s29 + $0xa0] sm:$0xff]  ;;  %v317_v3 = vld [vmem:[%s2271_s29 + $0x1a8] sm:$0xff]  ;;  %v383_v21 = vld [vmem:[%s2277_s24 + $0x1b8] sm:$0xff] }
  0x73   : > { %v348_v0 = vld [vmem:[%s2277_s24 + $0xa0] sm:$0xff]  ;;  %v381_v5 = vld [vmem:[%s2277_s24 + $0x1a8] sm:$0xff] }
  0x74   : > { %v352_v32 = vld [vmem:[%s2277_s24 + $0xc0] sm:$0xff]  ;;  %v353_v33 = vld [vmem:[%s2277_s24 + $0xc8] sm:$0xff] }
  0x75   : > { %v385_v37 = vld [vmem:[%s2277_s24 + $0x1c8] sm:$0xff] }
  0x77   : > { %817 = vmatmul.mubr.bf16.gmra.mxu0 %v1610_v10  ;;  %v1618_v10 = vcombine.low %v402_v54, %v403_v55  ;;  %v410_v54 = vmul.bf16 %v346_v48, %v282_v45  ;;  %v411_v55 = vmul.bf16 %v347_v49, %v283_v46  ;;  %v290_v45 = vld [vmem:[%s2271_s29 + $0xd0] sm:$0xff]  ;;  %v291_v46 = vld [vmem:[%s2271_s29 + $0xd8] sm:$0xff] }
  0x78   : > { %1234 = vmatmul.mubr.bf16.gmra.mxu1 %v1658_v11  ;;  %824 = vmatprep.mubr.bf16.mxu0 %v1613_v12  ;;  %v1666_v11 = vcombine.low %v434_v56, %v435_v57  ;;  %v1621_v12 = vcombine.high %v404_v6, %v405_v7  ;;  %v442_v56 = vmul.bf16 %v378_v52, %v314_v50  ;;  %v354_v48 = vld [vmem:[%s2277_s24 + $0xd0] sm:$0xff]  ;;  %v355_v49 = vld [vmem:[%s2277_s24 + $0xd8] sm:$0xff] }
  0x79   : > { %1241 = vmatprep.mubr.bf16.mxu1 %v1661_v15  ;;  %v1669_v15 = vcombine.high %v436_v8, %v437_v9  ;;  %v443_v57 = vmul.bf16 %v379_v53, %v315_v51  ;;  %v322_v50 = vld [vmem:[%s2271_s29 + $0x1d0] sm:$0xff]  ;;  %v323_v51 = vld [vmem:[%s2271_s29 + $0x1d8] sm:$0xff] }
  0x7a   : > { %v386_v52 = vld [vmem:[%s2277_s24 + $0x1d0] sm:$0xff]  ;;  %v387_v53 = vld [vmem:[%s2277_s24 + $0x1d8] sm:$0xff] }
  0x7f   : > { %825 = vmatmul.mubr.bf16.gmra.mxu0 %v1612_v26  ;;  %v1620_v26 = vcombine.low %v404_v6, %v405_v7  ;;  %v412_v6 = vmul.bf16 %v348_v0, %v284_v61  ;;  %v413_v7 = vmul.bf16 %v349_v1, %v285_v62  ;;  %v292_v61 = vld [vmem:[%s2271_s29 + $0xe0] sm:$0xff]  ;;  %v293_v62 = vld [vmem:[%s2271_s29 + $0xe8] sm:$0xff] }
  0x80   : > { %1242 = vmatmul.mubr.bf16.gmra.mxu1 %v1660_v27  ;;  %832 = vmatprep.mubr.bf16.mxu0 %v1615_v28  ;;  %v1668_v27 = vcombine.low %v436_v8, %v437_v9  ;;  %v1623_v28 = vcombine.high %v406_v22, %v407_v23  ;;  %v444_v8 = vmul.bf16 %v380_v4, %v316_v2  ;;  %v356_v0 = vld [vmem:[%s2277_s24 + $0xe0] sm:$0xff]  ;;  %v357_v1 = vld [vmem:[%s2277_s24 + $0xe8] sm:$0xff] }
  0x81   : > { %1249 = vmatprep.mubr.bf16.mxu1 %v1663_v31  ;;  %v1671_v31 = vcombine.high %v438_v24, %v439_v25  ;;  %v445_v9 = vmul.bf16 %v381_v5, %v317_v3  ;;  %v324_v2 = vld [vmem:[%s2271_s29 + $0x1e0] sm:$0xff]  ;;  %v325_v3 = vld [vmem:[%s2271_s29 + $0x1e8] sm:$0xff] }
  0x82   : > { %v388_v4 = vld [vmem:[%s2277_s24 + $0x1e0] sm:$0xff]  ;;  %v389_v5 = vld [vmem:[%s2277_s24 + $0x1e8] sm:$0xff] }
  0x87   : > { %833 = vmatmul.mubr.bf16.gmra.mxu0 %v1614_v42  ;;  %v1622_v42 = vcombine.low %v406_v22, %v407_v23  ;;  %v414_v22 = vmul.bf16 %v350_v16, %v286_v13  ;;  %v415_v23 = vmul.bf16 %v351_v17, %v287_v14  ;;  %v294_v13 = vld [vmem:[%s2271_s29 + $0xf0] sm:$0xff]  ;;  %v295_v14 = vld [vmem:[%s2271_s29 + $0xf8] sm:$0xff] }
  0x88   : > { %1250 = vmatmul.mubr.bf16.gmra.mxu1 %v1662_v43  ;;  %840 = vmatprep.mubr.bf16.mxu0 %v1617_v44  ;;  %v1670_v43 = vcombine.low %v438_v24, %v439_v25  ;;  %v1625_v44 = vcombine.high %v408_v38, %v409_v39  ;;  %v446_v24 = vmul.bf16 %v382_v20, %v318_v18  ;;  %v358_v16 = vld [vmem:[%s2277_s24 + $0xf0] sm:$0xff]  ;;  %v359_v17 = vld [vmem:[%s2277_s24 + $0xf8] sm:$0xff] }
  0x89   : > { %1257 = vmatprep.mubr.bf16.mxu1 %v1665_v47  ;;  %v1673_v47 = vcombine.high %v440_v40, %v441_v41  ;;  %v447_v25 = vmul.bf16 %v383_v21, %v319_v19  ;;  %v326_v18 = vld [vmem:[%s2271_s29 + $0x1f0] sm:$0xff]  ;;  %v327_v19 = vld [vmem:[%s2271_s29 + $0x1f8] sm:$0xff] }
  0x8a   : > { %v390_v20 = vld [vmem:[%s2277_s24 + $0x1f0] sm:$0xff]  ;;  %v391_v21 = vld [vmem:[%s2277_s24 + $0x1f8] sm:$0xff] }
  0x8f   : > { %841 = vmatmul.mubr.bf16.gmra.mxu0 %v1616_v58  ;;  %v1624_v58 = vcombine.low %v408_v38, %v409_v39  ;;  %v416_v38 = vmul.bf16 %v352_v32, %v288_v29  ;;  %v417_v39 = vmul.bf16 %v353_v33, %v289_v30 }
  0x90   : > { %1258 = vmatmul.mubr.bf16.gmra.mxu1 %v1664_v59  ;;  %848 = vmatprep.mubr.bf16.mxu0 %v1619_v60  ;;  %v1672_v59 = vcombine.low %v440_v40, %v441_v41  ;;  %v1627_v60 = vcombine.high %v410_v54, %v411_v55  ;;  %v448_v40 = vmul.bf16 %v384_v36, %v320_v34 }
  0x91   : > { %1265 = vmatprep.mubr.bf16.mxu1 %v1667_v63  ;;  %v1675_v63 = vcombine.high %v442_v56, %v443_v57  ;;  %v449_v41 = vmul.bf16 %v385_v37, %v321_v35 }
  0x97   : > { %849 = vmatmul.mubr.bf16.gmra.mxu0 %v1618_v10  ;;  %v1626_v10 = vcombine.low %v410_v54, %v411_v55  ;;  %v418_v54 = vmul.bf16 %v354_v48, %v290_v45  ;;  %v419_v55 = vmul.bf16 %v355_v49, %v291_v46 }
  0x98   : > { %1266 = vmatmul.mubr.bf16.gmra.mxu1 %v1666_v11  ;;  %856 = vmatprep.mubr.bf16.mxu0 %v1621_v12  ;;  %v1674_v11 = vcombine.low %v442_v56, %v443_v57  ;;  %v1629_v12 = vcombine.high %v412_v6, %v413_v7  ;;  %v450_v56 = vmul.bf16 %v386_v52, %v322_v50 }
  0x99   : > { %1273 = vmatprep.mubr.bf16.mxu1 %v1669_v15  ;;  %v1677_v15 = vcombine.high %v444_v8, %v445_v9  ;;  %v451_v57 = vmul.bf16 %v387_v53, %v323_v51 }
  0x9f   : > { %857 = vmatmul.mubr.bf16.gmra.mxu0 %v1620_v26  ;;  %v1628_v26 = vcombine.low %v412_v6, %v413_v7  ;;  %v420_v6 = vmul.bf16 %v356_v0, %v292_v61  ;;  %v421_v7 = vmul.bf16 %v357_v1, %v293_v62 }
  0xa0   : > { %1274 = vmatmul.mubr.bf16.gmra.mxu1 %v1668_v27  ;;  %864 = vmatprep.mubr.bf16.mxu0 %v1623_v28  ;;  %v1676_v27 = vcombine.low %v444_v8, %v445_v9  ;;  %v1631_v28 = vcombine.high %v414_v22, %v415_v23  ;;  %v452_v8 = vmul.bf16 %v388_v4, %v324_v2 }
  0xa1   : > { %1281 = vmatprep.mubr.bf16.mxu1 %v1671_v31  ;;  %v1679_v31 = vcombine.high %v446_v24, %v447_v25  ;;  %v453_v9 = vmul.bf16 %v389_v5, %v325_v3 }
  0xa7   : > { %865 = vmatmul.mubr.bf16.gmra.mxu0 %v1622_v42  ;;  %v1630_v42 = vcombine.low %v414_v22, %v415_v23  ;;  %v422_v22 = vmul.bf16 %v358_v16, %v294_v13  ;;  %v423_v23 = vmul.bf16 %v359_v17, %v295_v14 }
  0xa8   : > { %1282 = vmatmul.mubr.bf16.gmra.mxu1 %v1670_v43  ;;  %872 = vmatprep.mubr.bf16.mxu0 %v1625_v44  ;;  %v1678_v43 = vcombine.low %v446_v24, %v447_v25  ;;  %v1633_v44 = vcombine.high %v416_v38, %v417_v39  ;;  %v454_v24 = vmul.bf16 %v390_v20, %v326_v18 }
  0xa9   : > { %1289 = vmatprep.mubr.bf16.mxu1 %v1673_v47  ;;  %v1681_v47 = vcombine.high %v448_v40, %v449_v41  ;;  %v455_v25 = vmul.bf16 %v391_v21, %v327_v19  ;;  %v1638_v30 = vcombine.low %v422_v22, %v423_v23 }
  0xab   : > { %v1687_v29 = vcombine.high %v454_v24, %v455_v25 }
  0xaf   : > { %873 = vmatmul.mubr.bf16.gmra.mxu0 %v1624_v58  ;;  %v1632_v58 = vcombine.low %v416_v38, %v417_v39 }
  0xb0   : > { %1290 = vmatmul.mubr.bf16.gmra.mxu1 %v1672_v59  ;;  %880 = vmatprep.mubr.bf16.mxu0 %v1627_v60  ;;  %v1680_v59 = vcombine.low %v448_v40, %v449_v41  ;;  %v1635_v60 = vcombine.high %v418_v54, %v419_v55 }
  0xb1   : > { %1297 = vmatprep.mubr.bf16.mxu1 %v1675_v63  ;;  %v1683_v63 = vcombine.high %v450_v56, %v451_v57 }
  0xb7   : > { %881 = vmatmul.mubr.bf16.gmra.mxu0 %v1626_v10  ;;  %v1634_v10 = vcombine.low %v418_v54, %v419_v55 }
  0xb8   : > { %1298 = vmatmul.mubr.bf16.gmra.mxu1 %v1674_v11  ;;  %888 = vmatprep.mubr.bf16.mxu0 %v1629_v12  ;;  %v1682_v11 = vcombine.low %v450_v56, %v451_v57  ;;  %v1637_v12 = vcombine.high %v420_v6, %v421_v7 }
  0xb9   : > { %1305 = vmatprep.mubr.bf16.mxu1 %v1677_v15  ;;  %v1685_v15 = vcombine.high %v452_v8, %v453_v9 }
  0xbf   : > { %889 = vmatmul.mubr.bf16.gmra.mxu0 %v1628_v26  ;;  %v1636_v26 = vcombine.low %v420_v6, %v421_v7 }
  0xc0   : > { %1306 = vmatmul.mubr.bf16.gmra.mxu1 %v1676_v27  ;;  %896 = vmatprep.mubr.bf16.mxu0 %v1631_v28  ;;  %v1684_v27 = vcombine.low %v452_v8, %v453_v9  ;;  %v1639_v28 = vcombine.high %v422_v22, %v423_v23 }
  0xc1   : > { %1313 = vmatprep.mubr.bf16.mxu1 %v1679_v31  ;;  %v1686_v31 = vcombine.low %v454_v24, %v455_v25 }
  0xc7   : > { %897 = vmatmul.mubr.bf16.gmra.mxu0 %v1630_v42 }
  0xc8   : > { %1314 = vmatmul.mubr.bf16.gmra.mxu1 %v1678_v43  ;;  %904 = vmatprep.mubr.bf16.mxu0 %v1633_v44 }
  0xc9   : > { %1321 = vmatprep.mubr.bf16.mxu1 %v1681_v47 }
  0xcf   : > { %905 = vmatmul.mubr.bf16.gmra.mxu0 %v1632_v58 }
  0xd0   : > { %1322 = vmatmul.mubr.bf16.gmra.mxu1 %v1680_v59  ;;  %912 = vmatprep.mubr.bf16.mxu0 %v1635_v60 }
  0xd1   : > { %1329 = vmatprep.mubr.bf16.mxu1 %v1683_v63 }
  0xd7   : > { %913 = vmatmul.mubr.bf16.gmra.mxu0 %v1634_v10 }
  0xd8   : > { %1330 = vmatmul.mubr.bf16.gmra.mxu1 %v1682_v11  ;;  %920 = vmatprep.mubr.bf16.mxu0 %v1637_v12 }
  0xd9   : > { %1337 = vmatprep.mubr.bf16.mxu1 %v1685_v15 }
  0xdf   : > { %921 = vmatmul.mubr.bf16.gmra.mxu0 %v1636_v26 }
  0xe0   : > { %1338 = vmatmul.mubr.bf16.gmra.mxu1 %v1684_v27  ;;  %928 = vmatprep.mubr.bf16.mxu0 %v1639_v28 }
  0xe1   : > { %1345 = vmatprep.mubr.bf16.mxu1 %v1687_v29 }
  0xe7   : > { %929 = vmatmul.mubr.bf16.gmra.mxu0 %v1638_v30 }
  0xe8   : > { %1346 = vmatmul.mubr.bf16.gmra.mxu1 %v1686_v31 }
 0x12f   : > { %v1728_v32 = vpop.f32.mrf.mxu0 }
 0x130   : > { %v1840_v33 = vpop.f32.mrf.mxu1 }
 0x131   : > { %v1729_v34 = vpop.f32.mrf.mxu0 }
 0x132   : > { %v1730_v35 = vadd.f32 %v1729_v34, %v1728_v32  ;;  %v1841_v36 = vpop.f32.mrf.mxu1 }
 0x133   : > { %v1842_v37 = vadd.f32 %v1841_v36, %v1840_v33  ;;  %v1731_v38 = vpop.f32.mrf.mxu0 }
 0x134   : > { %v1354_v39 = vmul.f32 1.1111112, %v1730_v35  ;;  %v1843_v40 = vpop.f32.mrf.mxu1 }
 0x135   : > { %v1386_v41 = vmul.f32 1.1111112, %v1842_v37  ;;  %v1732_v42 = vpop.f32.mrf.mxu0 }
 0x136   : > { %1419 = vst.msk [vmem:[%s2457_s27] sm:$0xff] %vm1418_vm0, %v1354_v39  ;;  %v1733_v43 = vadd.f32 %v1732_v42, %v1731_v38  ;;  %v1844_v44 = vpop.f32.mrf.mxu1 }
 0x137   : > { %1451 = vst.msk [vmem:[%s2457_s27 + $0x100] sm:$0xff] %vm1418_vm0, %v1386_v41  ;;  %v1845_v45 = vadd.f32 %v1844_v44, %v1843_v40  ;;  %v1734_v46 = vpop.f32.mrf.mxu0 }
 0x138   : > { %v1355_v47 = vmul.f32 1.1111112, %v1733_v43  ;;  %v1846_v48 = vpop.f32.mrf.mxu1 }
 0x139   : > { %v1387_v49 = vmul.f32 1.1111112, %v1845_v45  ;;  %v1735_v50 = vpop.f32.mrf.mxu0 }
 0x13a   : > { %1420 = vst.msk [vmem:[%s2457_s27 + $0x8] sm:$0xff] %vm1418_vm0, %v1355_v47  ;;  %v1736_v51 = vadd.f32 %v1735_v50, %v1734_v46  ;;  %v1847_v52 = vpop.f32.mrf.mxu1 }
 0x13b   : > { %1452 = vst.msk [vmem:[%s2457_s27 + $0x108] sm:$0xff] %vm1418_vm0, %v1387_v49  ;;  %v1848_v53 = vadd.f32 %v1847_v52, %v1846_v48  ;;  %v1737_v54 = vpop.f32.mrf.mxu0 }
 0x13c   : > { %v1356_v55 = vmul.f32 1.1111112, %v1736_v51  ;;  %v1849_v56 = vpop.f32.mrf.mxu1 }
 0x13d   : > { %v1388_v57 = vmul.f32 1.1111112, %v1848_v53  ;;  %v1738_v58 = vpop.f32.mrf.mxu0 }
 0x13e   : > { %1421 = vst.msk [vmem:[%s2457_s27 + $0x10] sm:$0xff] %vm1418_vm0, %v1356_v55  ;;  %v1739_v59 = vadd.f32 %v1738_v58, %v1737_v54  ;;  %v1850_v60 = vpop.f32.mrf.mxu1 }
 0x13f   : > { %1453 = vst.msk [vmem:[%s2457_s27 + $0x110] sm:$0xff] %vm1418_vm0, %v1388_v57  ;;  %v1851_v61 = vadd.f32 %v1850_v60, %v1849_v56  ;;  %v1740_v62 = vpop.f32.mrf.mxu0 }
 0x140   : > { %v1357_v63 = vmul.f32 1.1111112, %v1739_v59  ;;  %v1852_v0 = vpop.f32.mrf.mxu1 }
 0x141   : > { %v1389_v1 = vmul.f32 1.1111112, %v1851_v61  ;;  %v1741_v2 = vpop.f32.mrf.mxu0 }
 0x142   : > { %1422 = vst.msk [vmem:[%s2457_s27 + $0x18] sm:$0xff] %vm1418_vm0, %v1357_v63  ;;  %v1742_v3 = vadd.f32 %v1741_v2, %v1740_v62  ;;  %v1853_v4 = vpop.f32.mrf.mxu1 }
 0x143   : > { %1454 = vst.msk [vmem:[%s2457_s27 + $0x118] sm:$0xff] %vm1418_vm0, %v1389_v1  ;;  %v1854_v5 = vadd.f32 %v1853_v4, %v1852_v0  ;;  %v1743_v6 = vpop.f32.mrf.mxu0 }
 0x144   : > { %v1358_v7 = vmul.f32 1.1111112, %v1742_v3  ;;  %v1855_v8 = vpop.f32.mrf.mxu1 }
 0x145   : > { %v1390_v9 = vmul.f32 1.1111112, %v1854_v5  ;;  %v1744_v10 = vpop.f32.mrf.mxu0 }
 0x146   : > { %1423 = vst.msk [vmem:[%s2457_s27 + $0x20] sm:$0xff] %vm1418_vm0, %v1358_v7  ;;  %v1745_v11 = vadd.f32 %v1744_v10, %v1743_v6  ;;  %v1856_v12 = vpop.f32.mrf.mxu1 }
 0x147   : > { %1455 = vst.msk [vmem:[%s2457_s27 + $0x120] sm:$0xff] %vm1418_vm0, %v1390_v9  ;;  %v1857_v13 = vadd.f32 %v1856_v12, %v1855_v8  ;;  %v1746_v14 = vpop.f32.mrf.mxu0 }
 0x148   : > { %v1359_v15 = vmul.f32 1.1111112, %v1745_v11  ;;  %v1858_v16 = vpop.f32.mrf.mxu1 }
 0x149   : > { %v1391_v17 = vmul.f32 1.1111112, %v1857_v13  ;;  %v1747_v18 = vpop.f32.mrf.mxu0 }
 0x14a   : > { %1424 = vst.msk [vmem:[%s2457_s27 + $0x28] sm:$0xff] %vm1418_vm0, %v1359_v15  ;;  %v1748_v19 = vadd.f32 %v1747_v18, %v1746_v14  ;;  %v1859_v20 = vpop.f32.mrf.mxu1 }
 0x14b   : > { %1456 = vst.msk [vmem:[%s2457_s27 + $0x128] sm:$0xff] %vm1418_vm0, %v1391_v17  ;;  %v1860_v21 = vadd.f32 %v1859_v20, %v1858_v16  ;;  %v1749_v22 = vpop.f32.mrf.mxu0 }
 0x14c   : > { %v1360_v23 = vmul.f32 1.1111112, %v1748_v19  ;;  %v1861_v24 = vpop.f32.mrf.mxu1 }
 0x14d   : > { %v1392_v25 = vmul.f32 1.1111112, %v1860_v21  ;;  %v1750_v26 = vpop.f32.mrf.mxu0 }
 0x14e   : > { %1425 = vst.msk [vmem:[%s2457_s27 + $0x30] sm:$0xff] %vm1418_vm0, %v1360_v23  ;;  %v1751_v27 = vadd.f32 %v1750_v26, %v1749_v22  ;;  %v1862_v28 = vpop.f32.mrf.mxu1 }
 0x14f   : > { %1457 = vst.msk [vmem:[%s2457_s27 + $0x130] sm:$0xff] %vm1418_vm0, %v1392_v25  ;;  %v1863_v29 = vadd.f32 %v1862_v28, %v1861_v24  ;;  %v1752_v30 = vpop.f32.mrf.mxu0 }
 0x150   : > { %v1361_v31 = vmul.f32 1.1111112, %v1751_v27  ;;  %v1864_v32 = vpop.f32.mrf.mxu1 }
 0x151   : > { %v1393_v33 = vmul.f32 1.1111112, %v1863_v29  ;;  %v1753_v34 = vpop.f32.mrf.mxu0 }
 0x152   : > { %1426 = vst.msk [vmem:[%s2457_s27 + $0x38] sm:$0xff] %vm1418_vm0, %v1361_v31  ;;  %v1754_v35 = vadd.f32 %v1753_v34, %v1752_v30  ;;  %v1865_v36 = vpop.f32.mrf.mxu1 }
 0x153   : > { %1458 = vst.msk [vmem:[%s2457_s27 + $0x138] sm:$0xff] %vm1418_vm0, %v1393_v33  ;;  %v1866_v37 = vadd.f32 %v1865_v36, %v1864_v32  ;;  %v1755_v38 = vpop.f32.mrf.mxu0 }
 0x154   : > { %v1362_v39 = vmul.f32 1.1111112, %v1754_v35  ;;  %v1867_v40 = vpop.f32.mrf.mxu1 }
 0x155   : > { %v1394_v41 = vmul.f32 1.1111112, %v1866_v37  ;;  %v1756_v42 = vpop.f32.mrf.mxu0 }
 0x156   : > { %1427 = vst.msk [vmem:[%s2457_s27 + $0x40] sm:$0xff] %vm1418_vm0, %v1362_v39  ;;  %v1757_v43 = vadd.f32 %v1756_v42, %v1755_v38  ;;  %v1868_v44 = vpop.f32.mrf.mxu1 }
 0x157   : > { %1459 = vst.msk [vmem:[%s2457_s27 + $0x140] sm:$0xff] %vm1418_vm0, %v1394_v41  ;;  %v1869_v45 = vadd.f32 %v1868_v44, %v1867_v40  ;;  %v1758_v46 = vpop.f32.mrf.mxu0 }
 0x158   : > { %v1363_v47 = vmul.f32 1.1111112, %v1757_v43  ;;  %v1870_v48 = vpop.f32.mrf.mxu1 }
 0x159   : > { %v1395_v49 = vmul.f32 1.1111112, %v1869_v45  ;;  %v1759_v50 = vpop.f32.mrf.mxu0 }
 0x15a   : > { %1428 = vst.msk [vmem:[%s2457_s27 + $0x48] sm:$0xff] %vm1418_vm0, %v1363_v47  ;;  %v1760_v51 = vadd.f32 %v1759_v50, %v1758_v46  ;;  %v1871_v52 = vpop.f32.mrf.mxu1 }
 0x15b   : > { %1460 = vst.msk [vmem:[%s2457_s27 + $0x148] sm:$0xff] %vm1418_vm0, %v1395_v49  ;;  %v1872_v53 = vadd.f32 %v1871_v52, %v1870_v48  ;;  %v1761_v54 = vpop.f32.mrf.mxu0 }
 0x15c   : > { %v1364_v55 = vmul.f32 1.1111112, %v1760_v51  ;;  %v1873_v56 = vpop.f32.mrf.mxu1 }
 0x15d   : > { %v1396_v57 = vmul.f32 1.1111112, %v1872_v53  ;;  %v1762_v58 = vpop.f32.mrf.mxu0 }
 0x15e   : > { %1429 = vst.msk [vmem:[%s2457_s27 + $0x50] sm:$0xff] %vm1418_vm0, %v1364_v55  ;;  %v1763_v59 = vadd.f32 %v1762_v58, %v1761_v54  ;;  %v1874_v60 = vpop.f32.mrf.mxu1 }
 0x15f   : > { %1461 = vst.msk [vmem:[%s2457_s27 + $0x150] sm:$0xff] %vm1418_vm0, %v1396_v57  ;;  %v1875_v61 = vadd.f32 %v1874_v60, %v1873_v56  ;;  %v1764_v62 = vpop.f32.mrf.mxu0 }
 0x160   : > { %v1365_v63 = vmul.f32 1.1111112, %v1763_v59  ;;  %v1876_v0 = vpop.f32.mrf.mxu1 }
 0x161   : > { %v1397_v1 = vmul.f32 1.1111112, %v1875_v61  ;;  %v1765_v2 = vpop.f32.mrf.mxu0 }
 0x162   : > { %1430 = vst.msk [vmem:[%s2457_s27 + $0x58] sm:$0xff] %vm1418_vm0, %v1365_v63  ;;  %v1766_v3 = vadd.f32 %v1765_v2, %v1764_v62  ;;  %v1877_v4 = vpop.f32.mrf.mxu1 }
 0x163   : > { %1462 = vst.msk [vmem:[%s2457_s27 + $0x158] sm:$0xff] %vm1418_vm0, %v1397_v1  ;;  %v1878_v5 = vadd.f32 %v1877_v4, %v1876_v0  ;;  %v1767_v6 = vpop.f32.mrf.mxu0 }
 0x164   : > { %v1366_v7 = vmul.f32 1.1111112, %v1766_v3  ;;  %v1879_v8 = vpop.f32.mrf.mxu1 }
 0x165   : > { %v1398_v9 = vmul.f32 1.1111112, %v1878_v5  ;;  %v1768_v10 = vpop.f32.mrf.mxu0 }
 0x166   : > { %1431 = vst.msk [vmem:[%s2457_s27 + $0x60] sm:$0xff] %vm1418_vm0, %v1366_v7  ;;  %v1769_v11 = vadd.f32 %v1768_v10, %v1767_v6  ;;  %v1880_v12 = vpop.f32.mrf.mxu1 }
 0x167   : > { %1463 = vst.msk [vmem:[%s2457_s27 + $0x160] sm:$0xff] %vm1418_vm0, %v1398_v9  ;;  %v1881_v13 = vadd.f32 %v1880_v12, %v1879_v8  ;;  %v1770_v14 = vpop.f32.mrf.mxu0 }
 0x168   : > { %v1367_v15 = vmul.f32 1.1111112, %v1769_v11  ;;  %v1882_v16 = vpop.f32.mrf.mxu1 }
 0x169   : > { %v1399_v17 = vmul.f32 1.1111112, %v1881_v13  ;;  %v1771_v18 = vpop.f32.mrf.mxu0 }
 0x16a   : > { %1432 = vst.msk [vmem:[%s2457_s27 + $0x68] sm:$0xff] %vm1418_vm0, %v1367_v15  ;;  %v1772_v19 = vadd.f32 %v1771_v18, %v1770_v14  ;;  %v1883_v20 = vpop.f32.mrf.mxu1 }
 0x16b   : > { %1464 = vst.msk [vmem:[%s2457_s27 + $0x168] sm:$0xff] %vm1418_vm0, %v1399_v17  ;;  %v1884_v21 = vadd.f32 %v1883_v20, %v1882_v16  ;;  %v1773_v22 = vpop.f32.mrf.mxu0 }
 0x16c   : > { %v1368_v23 = vmul.f32 1.1111112, %v1772_v19  ;;  %v1885_v24 = vpop.f32.mrf.mxu1 }
 0x16d   : > { %v1400_v25 = vmul.f32 1.1111112, %v1884_v21  ;;  %v1774_v26 = vpop.f32.mrf.mxu0 }
 0x16e   : > { %1433 = vst.msk [vmem:[%s2457_s27 + $0x70] sm:$0xff] %vm1418_vm0, %v1368_v23  ;;  %v1775_v27 = vadd.f32 %v1774_v26, %v1773_v22  ;;  %v1886_v28 = vpop.f32.mrf.mxu1 }
 0x16f   : > { %1465 = vst.msk [vmem:[%s2457_s27 + $0x170] sm:$0xff] %vm1418_vm0, %v1400_v25  ;;  %v1887_v29 = vadd.f32 %v1886_v28, %v1885_v24  ;;  %v1776_v30 = vpop.f32.mrf.mxu0 }
 0x170   : > { %v1369_v31 = vmul.f32 1.1111112, %v1775_v27  ;;  %v1888_v32 = vpop.f32.mrf.mxu1 }
 0x171   : > { %v1401_v33 = vmul.f32 1.1111112, %v1887_v29  ;;  %v1777_v34 = vpop.f32.mrf.mxu0 }
 0x172   : > { %1434 = vst.msk [vmem:[%s2457_s27 + $0x78] sm:$0xff] %vm1418_vm0, %v1369_v31  ;;  %v1778_v35 = vadd.f32 %v1777_v34, %v1776_v30  ;;  %v1889_v36 = vpop.f32.mrf.mxu1 }
 0x173   : > { %1466 = vst.msk [vmem:[%s2457_s27 + $0x178] sm:$0xff] %vm1418_vm0, %v1401_v33  ;;  %v1890_v37 = vadd.f32 %v1889_v36, %v1888_v32  ;;  %v1779_v38 = vpop.f32.mrf.mxu0 }
 0x174   : > { %v1370_v39 = vmul.f32 1.1111112, %v1778_v35  ;;  %v1891_v40 = vpop.f32.mrf.mxu1 }
 0x175   : > { %v1402_v41 = vmul.f32 1.1111112, %v1890_v37  ;;  %v1780_v42 = vpop.f32.mrf.mxu0 }
 0x176   : > { %1435 = vst.msk [vmem:[%s2457_s27 + $0x80] sm:$0xff] %vm1418_vm0, %v1370_v39  ;;  %v1781_v43 = vadd.f32 %v1780_v42, %v1779_v38  ;;  %v1892_v44 = vpop.f32.mrf.mxu1 }
 0x177   : > { %1467 = vst.msk [vmem:[%s2457_s27 + $0x180] sm:$0xff] %vm1418_vm0, %v1402_v41  ;;  %v1893_v45 = vadd.f32 %v1892_v44, %v1891_v40  ;;  %v1782_v46 = vpop.f32.mrf.mxu0 }
 0x178   : > { %v1371_v47 = vmul.f32 1.1111112, %v1781_v43  ;;  %v1894_v48 = vpop.f32.mrf.mxu1 }
 0x179   : > { %v1403_v49 = vmul.f32 1.1111112, %v1893_v45  ;;  %v1783_v50 = vpop.f32.mrf.mxu0 }
 0x17a   : > { %1436 = vst.msk [vmem:[%s2457_s27 + $0x88] sm:$0xff] %vm1418_vm0, %v1371_v47  ;;  %v1784_v51 = vadd.f32 %v1783_v50, %v1782_v46  ;;  %v1895_v52 = vpop.f32.mrf.mxu1 }
 0x17b   : > { %1468 = vst.msk [vmem:[%s2457_s27 + $0x188] sm:$0xff] %vm1418_vm0, %v1403_v49  ;;  %v1896_v53 = vadd.f32 %v1895_v52, %v1894_v48  ;;  %v1785_v54 = vpop.f32.mrf.mxu0 }
 0x17c   : > { %v1372_v55 = vmul.f32 1.1111112, %v1784_v51  ;;  %v1897_v56 = vpop.f32.mrf.mxu1 }
 0x17d   : > { %v1404_v57 = vmul.f32 1.1111112, %v1896_v53  ;;  %v1786_v58 = vpop.f32.mrf.mxu0 }
 0x17e   : > { %1437 = vst.msk [vmem:[%s2457_s27 + $0x90] sm:$0xff] %vm1418_vm0, %v1372_v55  ;;  %v1787_v59 = vadd.f32 %v1786_v58, %v1785_v54  ;;  %v1898_v60 = vpop.f32.mrf.mxu1 }
 0x17f   : > { %1469 = vst.msk [vmem:[%s2457_s27 + $0x190] sm:$0xff] %vm1418_vm0, %v1404_v57  ;;  %v1899_v61 = vadd.f32 %v1898_v60, %v1897_v56  ;;  %v1788_v62 = vpop.f32.mrf.mxu0 }
 0x180   : > { %v1373_v63 = vmul.f32 1.1111112, %v1787_v59  ;;  %v1900_v0 = vpop.f32.mrf.mxu1 }
 0x181   : > { %v1405_v1 = vmul.f32 1.1111112, %v1899_v61  ;;  %v1789_v2 = vpop.f32.mrf.mxu0 }
 0x182   : > { %1438 = vst.msk [vmem:[%s2457_s27 + $0x98] sm:$0xff] %vm1418_vm0, %v1373_v63  ;;  %v1790_v3 = vadd.f32 %v1789_v2, %v1788_v62  ;;  %v1901_v4 = vpop.f32.mrf.mxu1 }
 0x183   : > { %1470 = vst.msk [vmem:[%s2457_s27 + $0x198] sm:$0xff] %vm1418_vm0, %v1405_v1  ;;  %v1902_v5 = vadd.f32 %v1901_v4, %v1900_v0  ;;  %v1791_v6 = vpop.f32.mrf.mxu0 }
 0x184   : > { %v1374_v7 = vmul.f32 1.1111112, %v1790_v3  ;;  %v1903_v8 = vpop.f32.mrf.mxu1 }
 0x185   : > { %v1406_v9 = vmul.f32 1.1111112, %v1902_v5  ;;  %v1792_v10 = vpop.f32.mrf.mxu0 }
 0x186   : > { %1439 = vst.msk [vmem:[%s2457_s27 + $0xa0] sm:$0xff] %vm1418_vm0, %v1374_v7  ;;  %v1793_v11 = vadd.f32 %v1792_v10, %v1791_v6  ;;  %v1904_v12 = vpop.f32.mrf.mxu1 }
 0x187   : > { %1471 = vst.msk [vmem:[%s2457_s27 + $0x1a0] sm:$0xff] %vm1418_vm0, %v1406_v9  ;;  %v1905_v13 = vadd.f32 %v1904_v12, %v1903_v8  ;;  %v1794_v14 = vpop.f32.mrf.mxu0 }
 0x188   : > { %v1375_v15 = vmul.f32 1.1111112, %v1793_v11  ;;  %v1906_v16 = vpop.f32.mrf.mxu1 }
 0x189   : > { %v1407_v17 = vmul.f32 1.1111112, %v1905_v13  ;;  %v1795_v18 = vpop.f32.mrf.mxu0 }
 0x18a   : > { %1440 = vst.msk [vmem:[%s2457_s27 + $0xa8] sm:$0xff] %vm1418_vm0, %v1375_v15  ;;  %v1796_v19 = vadd.f32 %v1795_v18, %v1794_v14  ;;  %v1907_v20 = vpop.f32.mrf.mxu1 }
 0x18b   : > { %1472 = vst.msk [vmem:[%s2457_s27 + $0x1a8] sm:$0xff] %vm1418_vm0, %v1407_v17  ;;  %v1908_v21 = vadd.f32 %v1907_v20, %v1906_v16  ;;  %v1797_v22 = vpop.f32.mrf.mxu0 }
 0x18c   : > { %v1376_v23 = vmul.f32 1.1111112, %v1796_v19  ;;  %v1909_v24 = vpop.f32.mrf.mxu1 }
 0x18d   : > { %v1408_v25 = vmul.f32 1.1111112, %v1908_v21  ;;  %v1798_v26 = vpop.f32.mrf.mxu0 }
 0x18e   : > { %1441 = vst.msk [vmem:[%s2457_s27 + $0xb0] sm:$0xff] %vm1418_vm0, %v1376_v23  ;;  %v1799_v27 = vadd.f32 %v1798_v26, %v1797_v22  ;;  %v1910_v28 = vpop.f32.mrf.mxu1 }
 0x18f   : > { %1473 = vst.msk [vmem:[%s2457_s27 + $0x1b0] sm:$0xff] %vm1418_vm0, %v1408_v25  ;;  %v1911_v29 = vadd.f32 %v1910_v28, %v1909_v24  ;;  %v1800_v30 = vpop.f32.mrf.mxu0 }
 0x190   : > { %v1377_v31 = vmul.f32 1.1111112, %v1799_v27  ;;  %v1912_v32 = vpop.f32.mrf.mxu1 }
 0x191   : > { %v1409_v33 = vmul.f32 1.1111112, %v1911_v29  ;;  %v1801_v34 = vpop.f32.mrf.mxu0 }
 0x192   : > { %1442 = vst.msk [vmem:[%s2457_s27 + $0xb8] sm:$0xff] %vm1418_vm0, %v1377_v31  ;;  %v1802_v35 = vadd.f32 %v1801_v34, %v1800_v30  ;;  %v1913_v36 = vpop.f32.mrf.mxu1 }
 0x193   : > { %1474 = vst.msk [vmem:[%s2457_s27 + $0x1b8] sm:$0xff] %vm1418_vm0, %v1409_v33  ;;  %v1914_v37 = vadd.f32 %v1913_v36, %v1912_v32  ;;  %v1803_v38 = vpop.f32.mrf.mxu0 }
 0x194   : > { %v1378_v39 = vmul.f32 1.1111112, %v1802_v35  ;;  %v1915_v40 = vpop.f32.mrf.mxu1 }
 0x195   : > { %v1410_v41 = vmul.f32 1.1111112, %v1914_v37  ;;  %v1804_v42 = vpop.f32.mrf.mxu0 }
 0x196   : > { %1443 = vst.msk [vmem:[%s2457_s27 + $0xc0] sm:$0xff] %vm1418_vm0, %v1378_v39  ;;  %v1805_v43 = vadd.f32 %v1804_v42, %v1803_v38  ;;  %v1916_v44 = vpop.f32.mrf.mxu1 }
 0x197   : > { %1475 = vst.msk [vmem:[%s2457_s27 + $0x1c0] sm:$0xff] %vm1418_vm0, %v1410_v41  ;;  %v1917_v45 = vadd.f32 %v1916_v44, %v1915_v40  ;;  %v1806_v46 = vpop.f32.mrf.mxu0 }
 0x198   : > { %v1379_v47 = vmul.f32 1.1111112, %v1805_v43  ;;  %v1918_v48 = vpop.f32.mrf.mxu1 }
 0x199   : > { %v1411_v49 = vmul.f32 1.1111112, %v1917_v45  ;;  %v1807_v50 = vpop.f32.mrf.mxu0 }
 0x19a   : > { %1444 = vst.msk [vmem:[%s2457_s27 + $0xc8] sm:$0xff] %vm1418_vm0, %v1379_v47  ;;  %v1808_v51 = vadd.f32 %v1807_v50, %v1806_v46  ;;  %v1919_v52 = vpop.f32.mrf.mxu1 }
 0x19b   : > { %1476 = vst.msk [vmem:[%s2457_s27 + $0x1c8] sm:$0xff] %vm1418_vm0, %v1411_v49  ;;  %v1920_v53 = vadd.f32 %v1919_v52, %v1918_v48  ;;  %v1809_v54 = vpop.f32.mrf.mxu0 }
 0x19c   : > { %v1380_v55 = vmul.f32 1.1111112, %v1808_v51  ;;  %v1921_v56 = vpop.f32.mrf.mxu1 }
 0x19d   : > { %v1412_v57 = vmul.f32 1.1111112, %v1920_v53  ;;  %v1810_v58 = vpop.f32.mrf.mxu0 }
 0x19e   : > { %1445 = vst.msk [vmem:[%s2457_s27 + $0xd0] sm:$0xff] %vm1418_vm0, %v1380_v55  ;;  %v1811_v59 = vadd.f32 %v1810_v58, %v1809_v54  ;;  %v1922_v60 = vpop.f32.mrf.mxu1 }
 0x19f   : > { %1477 = vst.msk [vmem:[%s2457_s27 + $0x1d0] sm:$0xff] %vm1418_vm0, %v1412_v57  ;;  %v1923_v61 = vadd.f32 %v1922_v60, %v1921_v56  ;;  %v1812_v62 = vpop.f32.mrf.mxu0 }
 0x1a0   : > { %v1381_v63 = vmul.f32 1.1111112, %v1811_v59  ;;  %v1924_v0 = vpop.f32.mrf.mxu1 }
 0x1a1   : > { %v1413_v1 = vmul.f32 1.1111112, %v1923_v61  ;;  %v1813_v2 = vpop.f32.mrf.mxu0 }
 0x1a2   : > { %1446 = vst.msk [vmem:[%s2457_s27 + $0xd8] sm:$0xff] %vm1418_vm0, %v1381_v63  ;;  %v1814_v3 = vadd.f32 %v1813_v2, %v1812_v62  ;;  %v1925_v4 = vpop.f32.mrf.mxu1 }
 0x1a3   : > { %1478 = vst.msk [vmem:[%s2457_s27 + $0x1d8] sm:$0xff] %vm1418_vm0, %v1413_v1  ;;  %v1926_v5 = vadd.f32 %v1925_v4, %v1924_v0  ;;  %v1815_v6 = vpop.f32.mrf.mxu0 }
 0x1a4   : > { %v1382_v7 = vmul.f32 1.1111112, %v1814_v3  ;;  %v1927_v8 = vpop.f32.mrf.mxu1 }
 0x1a5   : > { %v1414_v9 = vmul.f32 1.1111112, %v1926_v5  ;;  %v1816_v10 = vpop.f32.mrf.mxu0 }
 0x1a6   : > { %1447 = vst.msk [vmem:[%s2457_s27 + $0xe0] sm:$0xff] %vm1418_vm0, %v1382_v7  ;;  %v1817_v11 = vadd.f32 %v1816_v10, %v1815_v6  ;;  %v1928_v12 = vpop.f32.mrf.mxu1 }
 0x1a7   : > { %1479 = vst.msk [vmem:[%s2457_s27 + $0x1e0] sm:$0xff] %vm1418_vm0, %v1414_v9  ;;  %v1929_v13 = vadd.f32 %v1928_v12, %v1927_v8  ;;  %v1818_v14 = vpop.f32.mrf.mxu0 }
 0x1a8   : > { %v1383_v15 = vmul.f32 1.1111112, %v1817_v11  ;;  %v1930_v16 = vpop.f32.mrf.mxu1 }
 0x1a9   : > { %v1415_v17 = vmul.f32 1.1111112, %v1929_v13  ;;  %v1819_v18 = vpop.f32.mrf.mxu0 }
 0x1aa   : > { %1448 = vst.msk [vmem:[%s2457_s27 + $0xe8] sm:$0xff] %vm1418_vm0, %v1383_v15  ;;  %v1820_v19 = vadd.f32 %v1819_v18, %v1818_v14  ;;  %v1931_v20 = vpop.f32.mrf.mxu1 }
 0x1ab   : > { %1480 = vst.msk [vmem:[%s2457_s27 + $0x1e8] sm:$0xff] %vm1418_vm0, %v1415_v17  ;;  %v1932_v21 = vadd.f32 %v1931_v20, %v1930_v16  ;;  %v1821_v22 = vpop.f32.mrf.mxu0 }
 0x1ac   : > { %v1384_v23 = vmul.f32 1.1111112, %v1820_v19  ;;  %v1933_v24 = vpop.f32.mrf.mxu1 }
 0x1ad   : > { %v1416_v25 = vmul.f32 1.1111112, %v1932_v21  ;;  %v1822_v26 = vpop.f32.mrf.mxu0 }
 0x1ae   : > { %1449 = vst.msk [vmem:[%s2457_s27 + $0xf0] sm:$0xff] %vm1418_vm0, %v1384_v23  ;;  %v1823_v27 = vadd.f32 %v1822_v26, %v1821_v22  ;;  %v1934_v28 = vpop.f32.mrf.mxu1 }
 0x1af   : > { %1481 = vst.msk [vmem:[%s2457_s27 + $0x1f0] sm:$0xff] %vm1418_vm0, %v1416_v25  ;;  %v1935_v29 = vadd.f32 %v1934_v28, %v1933_v24 }
 0x1b0   : > { %v1385_v30 = vmul.f32 1.1111112, %v1823_v27 }
 0x1b1   : > { %v1417_v31 = vmul.f32 1.1111112, %v1935_v29 }
 0x1b2   : > { %1450 = vst.msk [vmem:[%s2457_s27 + $0xf8] sm:$0xff] %vm1418_vm0, %v1385_v30 }
 0x1b3   : > { %1482 = vst.msk [vmem:[%s2457_s27 + $0x1f8] sm:$0xff] %vm1418_vm0, %v1417_v31 }
 0x1b4 PF: > { %p16_p11 = scmp.ge.s32.totalorder %s2154_s17, 4   ;;  %s2610_s12 = smov %s2100_s13 }
 0x1b5   : > { %s2611_s13 = smov %s2104_s14  ;;  %s2612_s14 = smov %s2164_s20 }
 0x1b6   : > { %s2613_s15 = smov %s2154_s17  ;;  %18 = sbr.rel (!%p16_p11) target bundleno = 5 (0x5), region = 88 }
 0x1bb   :  { %1507 = vsyncpa [#allocation3], 1 }
 0x1bc   :  { %1509 = vsyncpa [#allocation3 + $0x1], 1 }
 0x1bd   :  { %1510 = vsyncpa [#allocation5], 1 }
 0x1be   :  { %1512 = vsyncpa [#allocation5 + $0x1], 1 }

</bundles_post_ra>
